<compile_context>
chip_gen: v7x
topology: tpu7x:2x2x1
jax: 0.10.0
libtpu: 0.0.40
codegen_flags: <defaults>
</compile_context>

<pallas_src>
import functools

import jax
import jax.numpy as jnp
from jax.experimental import pallas as pl
from jax.experimental.pallas import tpu as pltpu

EPS = 1e-5
LEAKY_SLOPE = 0.01


# ----------------------------- glue helpers (plain JAX) -----------------------------

def standardize_weight(w):
    """Weight standardization as in the custom Conv2d (PyTorch semantics, ddof=1 std)."""
    o = w.shape[0]
    mean = jnp.mean(w, axis=(1, 2, 3), keepdims=True)
    wc = w - mean
    std = jnp.std(wc.reshape(o, -1), axis=1, ddof=1).reshape(o, 1, 1, 1) + 1e-5
    return wc / std


def bilinear_upsample_nchw(x, h_out, w_out):
    """F.interpolate(..., mode='bilinear', align_corners=True) on NCHW input."""
    n, c, h_in, w_in = x.shape

    def coords(out, inp):
        if out == 1:
            return jnp.zeros((out,), jnp.float32)
        return jnp.arange(out, dtype=jnp.float32) * (float(inp - 1) / float(out - 1))

    hs = coords(h_out, h_in)
    ws = coords(w_out, w_in)
    h0 = jnp.floor(hs).astype(jnp.int32)
    h1 = jnp.minimum(h0 + 1, h_in - 1)
    ah = hs - h0.astype(jnp.float32)
    w0 = jnp.floor(ws).astype(jnp.int32)
    w1 = jnp.minimum(w0 + 1, w_in - 1)
    aw = ws - w0.astype(jnp.float32)

    xh = (x[:, :, h0, :] * (1.0 - ah)[None, None, :, None]
          + x[:, :, h1, :] * ah[None, None, :, None])
    out = (xh[:, :, :, w0] * (1.0 - aw)[None, None, None, :]
           + xh[:, :, :, w1] * aw[None, None, None, :])
    return out


# ----------------------------- fused Pallas kernel -----------------------------

def _lane_roll(x, shift, size):
    """out[:, p] = x[:, (p + shift) mod size] for a static shift (two static slices + concat)."""
    s = shift % size
    if s == 0:
        return x
    return jnp.concatenate([x[:, s:], x[:, :s]], axis=1)


def _upsample_gn_kernel(x_ref, w1_ref, w2_ref, p1_ref, p2_ref, g_ref, m_ref,
                        o_ref, *, H, W, cout, groups):
    """Fused [WS-Conv3x3 -> GroupNorm -> LeakyReLU] x 2 for one batch element.

    x_ref : (1, cin, HW)   unpadded bf16 channel-major input
    w*_ref: (cout, Kp)     bf16 packed conv weight, K rows ordered (dy, dx, cin), zero-padded
    p*_ref: (cout, 4)      f32 [bias | gamma | beta | 0] per channel
    g_ref : (cout, cout)   same-group indicator matrix (GroupNorm group sums)
    m_ref : (9, HW)        bf16 {0,1} border-validity mask per 3x3 tap
    o_ref : (1, cout, HW)  f32 channel-major output (lane-dense)
    """
    HW = H * W
    inv_cnt = 1.0 / float(HW * (cout // groups))       # elements per GroupNorm group

    def conv_gn_lrelu(x_cm, w_ref, p_ref):
        cin = x_cm.shape[0]
        kp = w_ref.shape[1]

        # ---- 3x3 conv as ONE matmul over stacked, masked, lane-rolled taps ----
        rows = []
        for dy in range(3):
            for dx in range(3):
                t = dy * 3 + dx
                off = (dy - 1) * W + (dx - 1)           # flattened spatial offset of this tap
                tap = _lane_roll(x_cm, off, HW)         # (cin, HW) bf16
                rows.append(tap * m_ref[t:t + 1, :])    # zero out-of-image contributions
        if kp > 9 * cin:
            rows.append(jnp.zeros((kp - 9 * cin, HW), jnp.bfloat16))
        s = jnp.concatenate(rows, axis=0)               # (Kp, HW) bf16, sublane-aligned stack

        y = jnp.dot(w_ref[...], s,
                    preferred_element_type=jnp.float32)  # (cout, HW) f32, K = Kp (~256)
        y = y + p_ref[:, 0:1]                            # + conv bias

        # ---- single-pass GroupNorm: group sums via tiny indicator matmul ----
        gy = jnp.dot(g_ref[...], y, preferred_element_type=jnp.float32)       # (cout, HW)
        gy2 = jnp.dot(g_ref[...], y * y, preferred_element_type=jnp.float32)  # (cout, HW)
        mean = jnp.sum(gy, axis=1, keepdims=True) * inv_cnt                    # (cout, 1)
        var = jnp.sum(gy2, axis=1, keepdims=True) * inv_cnt - mean * mean
        scale = p_ref[:, 1:2] * jax.lax.rsqrt(var + EPS)                       # gamma / std
        z = y * scale + (p_ref[:, 2:3] - mean * scale)                         # fused norm+affine
        return jnp.where(z >= 0.0, z, LEAKY_SLOPE * z)                         # LeakyReLU(0.01)

    h1 = conv_gn_lrelu(x_ref[0], w1_ref, p1_ref)                # (cout, HW) f32, stays on-chip
    h2 = conv_gn_lrelu(h1.astype(jnp.bfloat16), w2_ref, p2_ref)
    o_ref[0] = h2                                               # lane-dense channel-major store


# ----------------------------- UpSampleGN forward -----------------------------

def upsample_gn_forward(x_nchw, concat_nchw, params, *, num_groups=8):
    """Pallas-backed forward matching UpSampleGN.forward (NCHW in / NCHW out)."""
    h_out, w_out = concat_nchw.shape[2], concat_nchw.shape[3]
    up_x = bilinear_upsample_nchw(x_nchw, h_out, w_out)          # XLA glue
    f = jnp.concatenate([up_x, concat_nchw], axis=1)             # (N, cin, H, W)

    n, cin, H, W = f.shape
    cout = params["w1"].shape[0]
    assert cout % num_groups == 0
    HW = H * W

    # Unpadded, bf16, channel-major input: NCHW flattens straight into (N, cin, HW).
    x_cm = f.reshape(n, cin, HW).astype(jnp.bfloat16)

    # --- parameter preprocessing (weight standardization, K packing, bf16 relayout) ---
    def prep_w(w):
        ws = standardize_weight(w.astype(jnp.float32))           # (O, I, 3, 3)
        o, i = ws.shape[0], ws.shape[1]
        kp = 128 * pl.cdiv(9 * i, 128)                           # packed K, padded to 128-mult
        wp = jnp.transpose(ws, (0, 2, 3, 1)).reshape(o, 9 * i)   # rows ordered (dy, dx, cin)
        return jnp.pad(wp, ((0, 0), (0, kp - 9 * i))).astype(jnp.bfloat16)

    def prep_p(b, g, bt):
        cols = [b.astype(jnp.float32), g.astype(jnp.float32),
                bt.astype(jnp.float32), jnp.zeros_like(b, jnp.float32)]
        return jnp.stack(cols, axis=1)                           # (cout, 4)

    w1 = prep_w(params["w1"])
    w2 = prep_w(params["w2"])
    p1 = prep_p(params["b1"], params["g1"], params["bt1"])
    p2 = prep_p(params["b2"], params["g2"], params["bt2"])

    # Same-group indicator matrix (cout x cout) for GroupNorm group sums.
    cpg = cout // num_groups
    grp = jnp.arange(cout) // cpg
    gmat = (grp[:, None] == grp[None, :]).astype(jnp.float32)

    # Per-tap border-validity masks (9, HW) in {0, 1}.
    hh = jnp.arange(H)[:, None]
    ww = jnp.arange(W)[None, :]
    masks = []
    for dy in range(3):
        for dx in range(3):
            m = ((hh + dy - 1 >= 0) & (hh + dy - 1 < H)
                 & (ww + dx - 1 >= 0) & (ww + dx - 1 < W))
            masks.append(m.reshape(HW))
    tap_mask = jnp.stack(masks, axis=0).astype(jnp.bfloat16)     # (9, HW)

    kernel = functools.partial(_upsample_gn_kernel,
                               H=H, W=W, cout=cout, groups=num_groups)
    out = pl.pallas_call(
        kernel,
        out_shape=jax.ShapeDtypeStruct((n, cout, HW), jnp.float32),
        grid=(n,),
        in_specs=[
            pl.BlockSpec((1, cin, HW), lambda i: (i, 0, 0)),
            pl.BlockSpec(w1.shape, lambda i: (0, 0)),
            pl.BlockSpec(w2.shape, lambda i: (0, 0)),
            pl.BlockSpec((cout, 4), lambda i: (0, 0)),
            pl.BlockSpec((cout, 4), lambda i: (0, 0)),
            pl.BlockSpec((cout, cout), lambda i: (0, 0)),
            pl.BlockSpec((9, HW), lambda i: (0, 0)),
        ],
        out_specs=pl.BlockSpec((1, cout, HW), lambda i: (i, 0, 0)),
        compiler_params=pltpu.CompilerParams(
            dimension_semantics=("parallel",),
            # per-step footprint (blocks + in-kernel values) is well under 1 MiB;
            # 8 MiB leaves margin without reserving half of v7x's 64 MiB VMEM.
            vmem_limit_bytes=8 * 1024 * 1024,
        ),
    )(x_cm, w1, w2, p1, p2, gmat, tap_mask)

    return out.reshape(n, cout, H, W)                            # already NCHW / channel-major


# ----------------------------- pure-JAX reference (f32) -----------------------------

def _ref_block(x_nchw, w, b, gamma, beta, num_groups=8):
    ws = standardize_weight(w)
    y = jax.lax.conv_general_dilated(
        x_nchw, ws, window_strides=(1, 1), padding=((1, 1), (1, 1)),
        dimension_numbers=("NCHW", "OIHW", "NCHW"))
    y = y + b[None, :, None, None]
    n, c, h, wd = y.shape
    yg = y.reshape(n, num_groups, c // num_groups, h, wd)
    mean = yg.mean(axis=(2, 3, 4), keepdims=True)
    var = yg.var(axis=(2, 3, 4), keepdims=True)
    yn = (yg - mean) / jnp.sqrt(var + 1e-5)
    yn = yn.reshape(n, c, h, wd) * gamma[None, :, None, None] + beta[None, :, None, None]
    return jnp.where(yn >= 0.0, yn, 0.01 * yn)


def upsample_gn_reference(x_nchw, concat_nchw, params):
    h_out, w_out = concat_nchw.shape[2], concat_nchw.shape[3]
    up_x = bilinear_upsample_nchw(x_nchw, h_out, w_out)
    f = jnp.concatenate([up_x, concat_nchw], axis=1)
    h = _ref_block(f, params["w1"], params["b1"], params["g1"], params["bt1"])
    h = _ref_block(h, params["w2"], params["b2"], params["g2"], params["bt2"])
    return h


# ----------------------------- main -----------------------------

if __name__ == "__main__":
    key = jax.random.PRNGKey(0)
    k1, k2, k3, k4, k5, k6 = jax.random.split(key, 6)

    # x is the low-res feature map, concat_with is the skip connection.
    N = 2
    C_X, H_X, W_X = 4, 8, 8
    C_SKIP, H, W = 12, 16, 16
    SKIP_INPUT = C_X + C_SKIP          # = 16 (channel count after concat)
    OUT_FEATURES = 16                  # divisible by 8 for GroupNorm(8)

    x = jax.random.normal(k1, (N, C_X, H_X, W_X), jnp.float32)
    concat_with = jax.random.normal(k2, (N, C_SKIP, H, W), jnp.float32)

    params = {
        "w1": 0.1 * jax.random.normal(k3, (OUT_FEATURES, SKIP_INPUT, 3, 3), jnp.float32),
        "b1": 0.05 * jax.random.normal(k4, (OUT_FEATURES,), jnp.float32),
        "g1": jnp.ones((OUT_FEATURES,), jnp.float32),     # GroupNorm default affine init
        "bt1": jnp.zeros((OUT_FEATURES,), jnp.float32),
        "w2": 0.1 * jax.random.normal(k5, (OUT_FEATURES, OUT_FEATURES, 3, 3), jnp.float32),
        "b2": 0.05 * jax.random.normal(k6, (OUT_FEATURES,), jnp.float32),
        "g2": jnp.ones((OUT_FEATURES,), jnp.float32),
        "bt2": jnp.zeros((OUT_FEATURES,), jnp.float32),
    }

    out = jax.jit(upsample_gn_forward)(x, concat_with, params)
    out = jax.block_until_ready(out)

    ref = jax.block_until_ready(upsample_gn_reference(x, concat_with, params))
    assert out.shape == (N, OUT_FEATURES, H, W), out.shape
    # Tolerance reflects bf16 MXU operands / bf16 h1 hand-off vs. the pure-f32 reference.
    assert jnp.allclose(out, ref, atol=5e-2, rtol=5e-2), float(jnp.max(jnp.abs(out - ref)))

    print("KERNEL_OK")
</pallas_src>

<mosaic_0001>
module attributes {stable_mosaic.version = 11 : i64} {
  func.func @_upsample_gn_kernel(%arg0: i32, %arg1: memref<1x16x256xbf16, #tpu.memory_space<vmem>>, %arg2: memref<16x256xbf16, #tpu.memory_space<vmem>>, %arg3: memref<16x256xbf16, #tpu.memory_space<vmem>>, %arg4: memref<16x4xf32, #tpu.memory_space<vmem>>, %arg5: memref<16x4xf32, #tpu.memory_space<vmem>>, %arg6: memref<16x16xf32, #tpu.memory_space<vmem>>, %arg7: memref<9x256xbf16, #tpu.memory_space<vmem>>, %arg8: memref<1x16x256xf32, #tpu.memory_space<vmem>>) attributes {dimension_semantics = [#tpu.dimension_semantics<parallel>], iteration_bounds = array<i64: 2>, scalar_prefetch = 0 : i64, scratch_operands = 0 : i64, tpu.core_type = #tpu.core_type<tc>, window_params = [{transform_indices = @transform_0, window_bounds = array<i64: 1, 16, 256>}, {pipeline_mode = #tpu.pipeline_mode<synchronous>, transform_indices = @transform_1, window_bounds = array<i64: 16, 256>}, {pipeline_mode = #tpu.pipeline_mode<synchronous>, transform_indices = @transform_2, window_bounds = array<i64: 16, 256>}, {pipeline_mode = #tpu.pipeline_mode<synchronous>, transform_indices = @transform_3, window_bounds = array<i64: 16, 4>}, {pipeline_mode = #tpu.pipeline_mode<synchronous>, transform_indices = @transform_4, window_bounds = array<i64: 16, 4>}, {pipeline_mode = #tpu.pipeline_mode<synchronous>, transform_indices = @transform_5, window_bounds = array<i64: 16, 16>}, {pipeline_mode = #tpu.pipeline_mode<synchronous>, transform_indices = @transform_6, window_bounds = array<i64: 9, 256>}, {transform_indices = @transform_7, window_bounds = array<i64: 1, 16, 256>}]} {
    %c0 = arith.constant 0 : index
    %c0_0 = arith.constant 0 : index
    %c0_1 = arith.constant 0 : index
    %0 = vector.load %arg1[%c0, %c0_0, %c0_1] : memref<1x16x256xbf16, #tpu.memory_space<vmem>>, vector<1x16x256xbf16>
    %1 = vector.shape_cast %0 : vector<1x16x256xbf16> to vector<16x256xbf16>
    %2 = vector.extract_strided_slice %1 {offsets = [0, 239], sizes = [16, 17], strides = [1, 1]} : vector<16x256xbf16> to vector<16x17xbf16>
    %3 = vector.extract_strided_slice %1 {offsets = [0, 0], sizes = [16, 239], strides = [1, 1]} : vector<16x256xbf16> to vector<16x239xbf16>
    %4 = tpu.concatenate %2, %3 in 1 : vector<16x17xbf16>, vector<16x239xbf16> -> vector<16x256xbf16>
    %c0_2 = arith.constant 0 : index
    %c0_3 = arith.constant 0 : index
    %5 = vector.load %arg7[%c0_2, %c0_3] : memref<9x256xbf16, #tpu.memory_space<vmem>>, vector<1x256xbf16>
    %6 = vector.broadcast %5 : vector<1x256xbf16> to vector<16x256xbf16>
    %7 = arith.mulf %4, %6 : vector<16x256xbf16>
    %8 = vector.extract_strided_slice %1 {offsets = [0, 240], sizes = [16, 16], strides = [1, 1]} : vector<16x256xbf16> to vector<16x16xbf16>
    %9 = vector.extract_strided_slice %1 {offsets = [0, 0], sizes = [16, 240], strides = [1, 1]} : vector<16x256xbf16> to vector<16x240xbf16>
    %10 = tpu.concatenate %8, %9 in 1 : vector<16x16xbf16>, vector<16x240xbf16> -> vector<16x256xbf16>
    %c1 = arith.constant 1 : index
    %c0_4 = arith.constant 0 : index
    %11 = vector.load %arg7[%c1, %c0_4] : memref<9x256xbf16, #tpu.memory_space<vmem>>, vector<1x256xbf16>
    %12 = vector.broadcast %11 : vector<1x256xbf16> to vector<16x256xbf16>
    %13 = arith.mulf %10, %12 : vector<16x256xbf16>
    %14 = vector.extract_strided_slice %1 {offsets = [0, 241], sizes = [16, 15], strides = [1, 1]} : vector<16x256xbf16> to vector<16x15xbf16>
    %15 = vector.extract_strided_slice %1 {offsets = [0, 0], sizes = [16, 241], strides = [1, 1]} : vector<16x256xbf16> to vector<16x241xbf16>
    %16 = tpu.concatenate %14, %15 in 1 : vector<16x15xbf16>, vector<16x241xbf16> -> vector<16x256xbf16>
    %c2 = arith.constant 2 : index
    %c0_5 = arith.constant 0 : index
    %17 = vector.load %arg7[%c2, %c0_5] : memref<9x256xbf16, #tpu.memory_space<vmem>>, vector<1x256xbf16>
    %18 = vector.broadcast %17 : vector<1x256xbf16> to vector<16x256xbf16>
    %19 = arith.mulf %16, %18 : vector<16x256xbf16>
    %20 = vector.extract_strided_slice %1 {offsets = [0, 255], sizes = [16, 1], strides = [1, 1]} : vector<16x256xbf16> to vector<16x1xbf16>
    %21 = vector.extract_strided_slice %1 {offsets = [0, 0], sizes = [16, 255], strides = [1, 1]} : vector<16x256xbf16> to vector<16x255xbf16>
    %22 = tpu.concatenate %20, %21 in 1 : vector<16x1xbf16>, vector<16x255xbf16> -> vector<16x256xbf16>
    %c3 = arith.constant 3 : index
    %c0_6 = arith.constant 0 : index
    %23 = vector.load %arg7[%c3, %c0_6] : memref<9x256xbf16, #tpu.memory_space<vmem>>, vector<1x256xbf16>
    %24 = vector.broadcast %23 : vector<1x256xbf16> to vector<16x256xbf16>
    %25 = arith.mulf %22, %24 : vector<16x256xbf16>
    %c4 = arith.constant 4 : index
    %c0_7 = arith.constant 0 : index
    %26 = vector.load %arg7[%c4, %c0_7] : memref<9x256xbf16, #tpu.memory_space<vmem>>, vector<1x256xbf16>
    %27 = vector.broadcast %26 : vector<1x256xbf16> to vector<16x256xbf16>
    %28 = arith.mulf %1, %27 : vector<16x256xbf16>
    %29 = vector.extract_strided_slice %1 {offsets = [0, 1], sizes = [16, 255], strides = [1, 1]} : vector<16x256xbf16> to vector<16x255xbf16>
    %30 = vector.extract_strided_slice %1 {offsets = [0, 0], sizes = [16, 1], strides = [1, 1]} : vector<16x256xbf16> to vector<16x1xbf16>
    %31 = tpu.concatenate %29, %30 in 1 : vector<16x255xbf16>, vector<16x1xbf16> -> vector<16x256xbf16>
    %c5 = arith.constant 5 : index
    %c0_8 = arith.constant 0 : index
    %32 = vector.load %arg7[%c5, %c0_8] : memref<9x256xbf16, #tpu.memory_space<vmem>>, vector<1x256xbf16>
    %33 = vector.broadcast %32 : vector<1x256xbf16> to vector<16x256xbf16>
    %34 = arith.mulf %31, %33 : vector<16x256xbf16>
    %35 = vector.extract_strided_slice %1 {offsets = [0, 15], sizes = [16, 241], strides = [1, 1]} : vector<16x256xbf16> to vector<16x241xbf16>
    %36 = vector.extract_strided_slice %1 {offsets = [0, 0], sizes = [16, 15], strides = [1, 1]} : vector<16x256xbf16> to vector<16x15xbf16>
    %37 = tpu.concatenate %35, %36 in 1 : vector<16x241xbf16>, vector<16x15xbf16> -> vector<16x256xbf16>
    %c6 = arith.constant 6 : index
    %c0_9 = arith.constant 0 : index
    %38 = vector.load %arg7[%c6, %c0_9] : memref<9x256xbf16, #tpu.memory_space<vmem>>, vector<1x256xbf16>
    %39 = vector.broadcast %38 : vector<1x256xbf16> to vector<16x256xbf16>
    %40 = arith.mulf %37, %39 : vector<16x256xbf16>
    %41 = vector.extract_strided_slice %1 {offsets = [0, 16], sizes = [16, 240], strides = [1, 1]} : vector<16x256xbf16> to vector<16x240xbf16>
    %42 = vector.extract_strided_slice %1 {offsets = [0, 0], sizes = [16, 16], strides = [1, 1]} : vector<16x256xbf16> to vector<16x16xbf16>
    %43 = tpu.concatenate %41, %42 in 1 : vector<16x240xbf16>, vector<16x16xbf16> -> vector<16x256xbf16>
    %c7 = arith.constant 7 : index
    %c0_10 = arith.constant 0 : index
    %44 = vector.load %arg7[%c7, %c0_10] : memref<9x256xbf16, #tpu.memory_space<vmem>>, vector<1x256xbf16>
    %45 = vector.broadcast %44 : vector<1x256xbf16> to vector<16x256xbf16>
    %46 = arith.mulf %43, %45 : vector<16x256xbf16>
    %47 = vector.extract_strided_slice %1 {offsets = [0, 17], sizes = [16, 239], strides = [1, 1]} : vector<16x256xbf16> to vector<16x239xbf16>
    %48 = vector.extract_strided_slice %1 {offsets = [0, 0], sizes = [16, 17], strides = [1, 1]} : vector<16x256xbf16> to vector<16x17xbf16>
    %49 = tpu.concatenate %47, %48 in 1 : vector<16x239xbf16>, vector<16x17xbf16> -> vector<16x256xbf16>
    %c8 = arith.constant 8 : index
    %c0_11 = arith.constant 0 : index
    %50 = vector.load %arg7[%c8, %c0_11] : memref<9x256xbf16, #tpu.memory_space<vmem>>, vector<1x256xbf16>
    %51 = vector.broadcast %50 : vector<1x256xbf16> to vector<16x256xbf16>
    %52 = arith.mulf %49, %51 : vector<16x256xbf16>
    %cst = arith.constant 0.000000e+00 : bf16
    %53 = vector.broadcast %cst : bf16 to vector<112x256xbf16>
    %54 = tpu.concatenate %7, %13, %19, %25, %28, %34, %40, %46, %52, %53 in 0 : vector<16x256xbf16>, vector<16x256xbf16>, vector<16x256xbf16>, vector<16x256xbf16>, vector<16x256xbf16>, vector<16x256xbf16>, vector<16x256xbf16>, vector<16x256xbf16>, vector<16x256xbf16>, vector<112x256xbf16> -> vector<256x256xbf16>
    %c0_12 = arith.constant 0 : index
    %c0_13 = arith.constant 0 : index
    %55 = vector.load %arg2[%c0_12, %c0_13] : memref<16x256xbf16, #tpu.memory_space<vmem>>, vector<16x256xbf16>
    %cst_14 = arith.constant dense<0.000000e+00> : vector<16x256xf32>
    %56 = tpu.matmul %55, %54, %cst_14 {dimension_numbers = #tpu.dot_dimension_numbers<[1], [0], [0], [1], [0, 0, 1, 1], [], []>} : vector<16x256xbf16>, vector<256x256xbf16>, vector<16x256xf32> -> vector<16x256xf32>
    %c0_15 = arith.constant 0 : index
    %c0_16 = arith.constant 0 : index
    %57 = vector.load %arg4[%c0_15, %c0_16] : memref<16x4xf32, #tpu.memory_space<vmem>>, vector<16x1xf32>
    %58 = vector.broadcast %57 : vector<16x1xf32> to vector<16x256xf32>
    %59 = arith.addf %56, %58 : vector<16x256xf32>
    %c0_17 = arith.constant 0 : index
    %c0_18 = arith.constant 0 : index
    %60 = vector.load %arg6[%c0_17, %c0_18] : memref<16x16xf32, #tpu.memory_space<vmem>>, vector<16x16xf32>
    %cst_19 = arith.constant dense<0.000000e+00> : vector<16x256xf32>
    %61 = tpu.matmul %60, %59, %cst_19 {dimension_numbers = #tpu.dot_dimension_numbers<[1], [0], [0], [1], [0, 0, 1, 1], [], []>} : vector<16x16xf32>, vector<16x256xf32>, vector<16x256xf32> -> vector<16x256xf32>
    %c0_20 = arith.constant 0 : index
    %c0_21 = arith.constant 0 : index
    %62 = vector.load %arg6[%c0_20, %c0_21] : memref<16x16xf32, #tpu.memory_space<vmem>>, vector<16x16xf32>
    %63 = arith.mulf %59, %59 : vector<16x256xf32>
    %cst_22 = arith.constant dense<0.000000e+00> : vector<16x256xf32>
    %64 = tpu.matmul %62, %63, %cst_22 {dimension_numbers = #tpu.dot_dimension_numbers<[1], [0], [0], [1], [0, 0, 1, 1], [], []>} : vector<16x16xf32>, vector<16x256xf32>, vector<16x256xf32> -> vector<16x256xf32>
    %cst_23 = arith.constant dense<0.000000e+00> : vector<16xf32>
    %65 = vector.multi_reduction <add>, %61, %cst_23 [1] : vector<16x256xf32> to vector<16xf32>
    %66 = vector.shape_cast %65 : vector<16xf32> to vector<16x1xf32>
    %cst_24 = arith.constant 0.001953125 : f32
    %67 = vector.broadcast %cst_24 : f32 to vector<16x1xf32>
    %68 = arith.mulf %66, %67 : vector<16x1xf32>
    %cst_25 = arith.constant dense<0.000000e+00> : vector<16xf32>
    %69 = vector.multi_reduction <add>, %64, %cst_25 [1] : vector<16x256xf32> to vector<16xf32>
    %70 = vector.shape_cast %69 : vector<16xf32> to vector<16x1xf32>
    %cst_26 = arith.constant 0.001953125 : f32
    %71 = vector.broadcast %cst_26 : f32 to vector<16x1xf32>
    %72 = arith.mulf %70, %71 : vector<16x1xf32>
    %73 = arith.mulf %68, %68 : vector<16x1xf32>
    %74 = arith.subf %72, %73 : vector<16x1xf32>
    %c0_27 = arith.constant 0 : index
    %c1_28 = arith.constant 1 : index
    %75 = vector.load %arg4[%c0_27, %c1_28] : memref<16x4xf32, #tpu.memory_space<vmem>>, vector<16x1xf32>
    %cst_29 = arith.constant 9.99999974E-6 : f32
    %76 = vector.broadcast %cst_29 : f32 to vector<16x1xf32>
    %77 = arith.addf %74, %76 : vector<16x1xf32>
    %78 = math.rsqrt %77 : vector<16x1xf32>
    %79 = arith.mulf %75, %78 : vector<16x1xf32>
    %80 = vector.broadcast %79 : vector<16x1xf32> to vector<16x256xf32>
    %81 = arith.mulf %59, %80 : vector<16x256xf32>
    %c0_30 = arith.constant 0 : index
    %c2_31 = arith.constant 2 : index
    %82 = vector.load %arg4[%c0_30, %c2_31] : memref<16x4xf32, #tpu.memory_space<vmem>>, vector<16x1xf32>
    %83 = arith.mulf %68, %79 : vector<16x1xf32>
    %84 = arith.subf %82, %83 : vector<16x1xf32>
    %85 = vector.broadcast %84 : vector<16x1xf32> to vector<16x256xf32>
    %86 = arith.addf %81, %85 : vector<16x256xf32>
    %cst_32 = arith.constant 0.000000e+00 : f32
    %87 = vector.broadcast %cst_32 : f32 to vector<16x256xf32>
    %88 = arith.cmpf oge, %86, %87 : vector<16x256xf32>
    %cst_33 = arith.constant 0.00999999977 : f32
    %89 = vector.broadcast %cst_33 : f32 to vector<16x256xf32>
    %90 = arith.mulf %89, %86 : vector<16x256xf32>
    %91 = arith.select %88, %86, %90 : vector<16x256xi1>, vector<16x256xf32>
    %92 = arith.truncf %91 : vector<16x256xf32> to vector<16x256xbf16>
    %93 = vector.extract_strided_slice %92 {offsets = [0, 239], sizes = [16, 17], strides = [1, 1]} : vector<16x256xbf16> to vector<16x17xbf16>
    %94 = vector.extract_strided_slice %92 {offsets = [0, 0], sizes = [16, 239], strides = [1, 1]} : vector<16x256xbf16> to vector<16x239xbf16>
    %95 = tpu.concatenate %93, %94 in 1 : vector<16x17xbf16>, vector<16x239xbf16> -> vector<16x256xbf16>
    %c0_34 = arith.constant 0 : index
    %c0_35 = arith.constant 0 : index
    %96 = vector.load %arg7[%c0_34, %c0_35] : memref<9x256xbf16, #tpu.memory_space<vmem>>, vector<1x256xbf16>
    %97 = vector.broadcast %96 : vector<1x256xbf16> to vector<16x256xbf16>
    %98 = arith.mulf %95, %97 : vector<16x256xbf16>
    %99 = vector.extract_strided_slice %92 {offsets = [0, 240], sizes = [16, 16], strides = [1, 1]} : vector<16x256xbf16> to vector<16x16xbf16>
    %100 = vector.extract_strided_slice %92 {offsets = [0, 0], sizes = [16, 240], strides = [1, 1]} : vector<16x256xbf16> to vector<16x240xbf16>
    %101 = tpu.concatenate %99, %100 in 1 : vector<16x16xbf16>, vector<16x240xbf16> -> vector<16x256xbf16>
    %c1_36 = arith.constant 1 : index
    %c0_37 = arith.constant 0 : index
    %102 = vector.load %arg7[%c1_36, %c0_37] : memref<9x256xbf16, #tpu.memory_space<vmem>>, vector<1x256xbf16>
    %103 = vector.broadcast %102 : vector<1x256xbf16> to vector<16x256xbf16>
    %104 = arith.mulf %101, %103 : vector<16x256xbf16>
    %105 = vector.extract_strided_slice %92 {offsets = [0, 241], sizes = [16, 15], strides = [1, 1]} : vector<16x256xbf16> to vector<16x15xbf16>
    %106 = vector.extract_strided_slice %92 {offsets = [0, 0], sizes = [16, 241], strides = [1, 1]} : vector<16x256xbf16> to vector<16x241xbf16>
    %107 = tpu.concatenate %105, %106 in 1 : vector<16x15xbf16>, vector<16x241xbf16> -> vector<16x256xbf16>
    %c2_38 = arith.constant 2 : index
    %c0_39 = arith.constant 0 : index
    %108 = vector.load %arg7[%c2_38, %c0_39] : memref<9x256xbf16, #tpu.memory_space<vmem>>, vector<1x256xbf16>
    %109 = vector.broadcast %108 : vector<1x256xbf16> to vector<16x256xbf16>
    %110 = arith.mulf %107, %109 : vector<16x256xbf16>
    %111 = vector.extract_strided_slice %92 {offsets = [0, 255], sizes = [16, 1], strides = [1, 1]} : vector<16x256xbf16> to vector<16x1xbf16>
    %112 = vector.extract_strided_slice %92 {offsets = [0, 0], sizes = [16, 255], strides = [1, 1]} : vector<16x256xbf16> to vector<16x255xbf16>
    %113 = tpu.concatenate %111, %112 in 1 : vector<16x1xbf16>, vector<16x255xbf16> -> vector<16x256xbf16>
    %c3_40 = arith.constant 3 : index
    %c0_41 = arith.constant 0 : index
    %114 = vector.load %arg7[%c3_40, %c0_41] : memref<9x256xbf16, #tpu.memory_space<vmem>>, vector<1x256xbf16>
    %115 = vector.broadcast %114 : vector<1x256xbf16> to vector<16x256xbf16>
    %116 = arith.mulf %113, %115 : vector<16x256xbf16>
    %c4_42 = arith.constant 4 : index
    %c0_43 = arith.constant 0 : index
    %117 = vector.load %arg7[%c4_42, %c0_43] : memref<9x256xbf16, #tpu.memory_space<vmem>>, vector<1x256xbf16>
    %118 = vector.broadcast %117 : vector<1x256xbf16> to vector<16x256xbf16>
    %119 = arith.mulf %92, %118 : vector<16x256xbf16>
    %120 = vector.extract_strided_slice %92 {offsets = [0, 1], sizes = [16, 255], strides = [1, 1]} : vector<16x256xbf16> to vector<16x255xbf16>
    %121 = vector.extract_strided_slice %92 {offsets = [0, 0], sizes = [16, 1], strides = [1, 1]} : vector<16x256xbf16> to vector<16x1xbf16>
    %122 = tpu.concatenate %120, %121 in 1 : vector<16x255xbf16>, vector<16x1xbf16> -> vector<16x256xbf16>
    %c5_44 = arith.constant 5 : index
    %c0_45 = arith.constant 0 : index
    %123 = vector.load %arg7[%c5_44, %c0_45] : memref<9x256xbf16, #tpu.memory_space<vmem>>, vector<1x256xbf16>
    %124 = vector.broadcast %123 : vector<1x256xbf16> to vector<16x256xbf16>
    %125 = arith.mulf %122, %124 : vector<16x256xbf16>
    %126 = vector.extract_strided_slice %92 {offsets = [0, 15], sizes = [16, 241], strides = [1, 1]} : vector<16x256xbf16> to vector<16x241xbf16>
    %127 = vector.extract_strided_slice %92 {offsets = [0, 0], sizes = [16, 15], strides = [1, 1]} : vector<16x256xbf16> to vector<16x15xbf16>
    %128 = tpu.concatenate %126, %127 in 1 : vector<16x241xbf16>, vector<16x15xbf16> -> vector<16x256xbf16>
    %c6_46 = arith.constant 6 : index
    %c0_47 = arith.constant 0 : index
    %129 = vector.load %arg7[%c6_46, %c0_47] : memref<9x256xbf16, #tpu.memory_space<vmem>>, vector<1x256xbf16>
    %130 = vector.broadcast %129 : vector<1x256xbf16> to vector<16x256xbf16>
    %131 = arith.mulf %128, %130 : vector<16x256xbf16>
    %132 = vector.extract_strided_slice %92 {offsets = [0, 16], sizes = [16, 240], strides = [1, 1]} : vector<16x256xbf16> to vector<16x240xbf16>
    %133 = vector.extract_strided_slice %92 {offsets = [0, 0], sizes = [16, 16], strides = [1, 1]} : vector<16x256xbf16> to vector<16x16xbf16>
    %134 = tpu.concatenate %132, %133 in 1 : vector<16x240xbf16>, vector<16x16xbf16> -> vector<16x256xbf16>
    %c7_48 = arith.constant 7 : index
    %c0_49 = arith.constant 0 : index
    %135 = vector.load %arg7[%c7_48, %c0_49] : memref<9x256xbf16, #tpu.memory_space<vmem>>, vector<1x256xbf16>
    %136 = vector.broadcast %135 : vector<1x256xbf16> to vector<16x256xbf16>
    %137 = arith.mulf %134, %136 : vector<16x256xbf16>
    %138 = vector.extract_strided_slice %92 {offsets = [0, 17], sizes = [16, 239], strides = [1, 1]} : vector<16x256xbf16> to vector<16x239xbf16>
    %139 = vector.extract_strided_slice %92 {offsets = [0, 0], sizes = [16, 17], strides = [1, 1]} : vector<16x256xbf16> to vector<16x17xbf16>
    %140 = tpu.concatenate %138, %139 in 1 : vector<16x239xbf16>, vector<16x17xbf16> -> vector<16x256xbf16>
    %c8_50 = arith.constant 8 : index
    %c0_51 = arith.constant 0 : index
    %141 = vector.load %arg7[%c8_50, %c0_51] : memref<9x256xbf16, #tpu.memory_space<vmem>>, vector<1x256xbf16>
    %142 = vector.broadcast %141 : vector<1x256xbf16> to vector<16x256xbf16>
    %143 = arith.mulf %140, %142 : vector<16x256xbf16>
    %cst_52 = arith.constant 0.000000e+00 : bf16
    %144 = vector.broadcast %cst_52 : bf16 to vector<112x256xbf16>
    %145 = tpu.concatenate %98, %104, %110, %116, %119, %125, %131, %137, %143, %144 in 0 : vector<16x256xbf16>, vector<16x256xbf16>, vector<16x256xbf16>, vector<16x256xbf16>, vector<16x256xbf16>, vector<16x256xbf16>, vector<16x256xbf16>, vector<16x256xbf16>, vector<16x256xbf16>, vector<112x256xbf16> -> vector<256x256xbf16>
    %c0_53 = arith.constant 0 : index
    %c0_54 = arith.constant 0 : index
    %146 = vector.load %arg3[%c0_53, %c0_54] : memref<16x256xbf16, #tpu.memory_space<vmem>>, vector<16x256xbf16>
    %cst_55 = arith.constant dense<0.000000e+00> : vector<16x256xf32>
    %147 = tpu.matmul %146, %145, %cst_55 {dimension_numbers = #tpu.dot_dimension_numbers<[1], [0], [0], [1], [0, 0, 1, 1], [], []>} : vector<16x256xbf16>, vector<256x256xbf16>, vector<16x256xf32> -> vector<16x256xf32>
    %c0_56 = arith.constant 0 : index
    %c0_57 = arith.constant 0 : index
    %148 = vector.load %arg5[%c0_56, %c0_57] : memref<16x4xf32, #tpu.memory_space<vmem>>, vector<16x1xf32>
    %149 = vector.broadcast %148 : vector<16x1xf32> to vector<16x256xf32>
    %150 = arith.addf %147, %149 : vector<16x256xf32>
    %c0_58 = arith.constant 0 : index
    %c0_59 = arith.constant 0 : index
    %151 = vector.load %arg6[%c0_58, %c0_59] : memref<16x16xf32, #tpu.memory_space<vmem>>, vector<16x16xf32>
    %cst_60 = arith.constant dense<0.000000e+00> : vector<16x256xf32>
    %152 = tpu.matmul %151, %150, %cst_60 {dimension_numbers = #tpu.dot_dimension_numbers<[1], [0], [0], [1], [0, 0, 1, 1], [], []>} : vector<16x16xf32>, vector<16x256xf32>, vector<16x256xf32> -> vector<16x256xf32>
    %c0_61 = arith.constant 0 : index
    %c0_62 = arith.constant 0 : index
    %153 = vector.load %arg6[%c0_61, %c0_62] : memref<16x16xf32, #tpu.memory_space<vmem>>, vector<16x16xf32>
    %154 = arith.mulf %150, %150 : vector<16x256xf32>
    %cst_63 = arith.constant dense<0.000000e+00> : vector<16x256xf32>
    %155 = tpu.matmul %153, %154, %cst_63 {dimension_numbers = #tpu.dot_dimension_numbers<[1], [0], [0], [1], [0, 0, 1, 1], [], []>} : vector<16x16xf32>, vector<16x256xf32>, vector<16x256xf32> -> vector<16x256xf32>
    %cst_64 = arith.constant dense<0.000000e+00> : vector<16xf32>
    %156 = vector.multi_reduction <add>, %152, %cst_64 [1] : vector<16x256xf32> to vector<16xf32>
    %157 = vector.shape_cast %156 : vector<16xf32> to vector<16x1xf32>
    %cst_65 = arith.constant 0.001953125 : f32
    %158 = vector.broadcast %cst_65 : f32 to vector<16x1xf32>
    %159 = arith.mulf %157, %158 : vector<16x1xf32>
    %cst_66 = arith.constant dense<0.000000e+00> : vector<16xf32>
    %160 = vector.multi_reduction <add>, %155, %cst_66 [1] : vector<16x256xf32> to vector<16xf32>
    %161 = vector.shape_cast %160 : vector<16xf32> to vector<16x1xf32>
    %cst_67 = arith.constant 0.001953125 : f32
    %162 = vector.broadcast %cst_67 : f32 to vector<16x1xf32>
    %163 = arith.mulf %161, %162 : vector<16x1xf32>
    %164 = arith.mulf %159, %159 : vector<16x1xf32>
    %165 = arith.subf %163, %164 : vector<16x1xf32>
    %c0_68 = arith.constant 0 : index
    %c1_69 = arith.constant 1 : index
    %166 = vector.load %arg5[%c0_68, %c1_69] : memref<16x4xf32, #tpu.memory_space<vmem>>, vector<16x1xf32>
    %cst_70 = arith.constant 9.99999974E-6 : f32
    %167 = vector.broadcast %cst_70 : f32 to vector<16x1xf32>
    %168 = arith.addf %165, %167 : vector<16x1xf32>
    %169 = math.rsqrt %168 : vector<16x1xf32>
    %170 = arith.mulf %166, %169 : vector<16x1xf32>
    %171 = vector.broadcast %170 : vector<16x1xf32> to vector<16x256xf32>
    %172 = arith.mulf %150, %171 : vector<16x256xf32>
    %c0_71 = arith.constant 0 : index
    %c2_72 = arith.constant 2 : index
    %173 = vector.load %arg5[%c0_71, %c2_72] : memref<16x4xf32, #tpu.memory_space<vmem>>, vector<16x1xf32>
    %174 = arith.mulf %159, %170 : vector<16x1xf32>
    %175 = arith.subf %173, %174 : vector<16x1xf32>
    %176 = vector.broadcast %175 : vector<16x1xf32> to vector<16x256xf32>
    %177 = arith.addf %172, %176 : vector<16x256xf32>
    %cst_73 = arith.constant 0.000000e+00 : f32
    %178 = vector.broadcast %cst_73 : f32 to vector<16x256xf32>
    %179 = arith.cmpf oge, %177, %178 : vector<16x256xf32>
    %cst_74 = arith.constant 0.00999999977 : f32
    %180 = vector.broadcast %cst_74 : f32 to vector<16x256xf32>
    %181 = arith.mulf %180, %177 : vector<16x256xf32>
    %182 = arith.select %179, %177, %181 : vector<16x256xi1>, vector<16x256xf32>
    %c0_75 = arith.constant 0 : index
    %c0_76 = arith.constant 0 : index
    %c0_77 = arith.constant 0 : index
    %183 = vector.load %arg8[%c0_75, %c0_76, %c0_77] : memref<1x16x256xf32, #tpu.memory_space<vmem>>, vector<1x16x256xf32>
    %184 = vector.shape_cast %183 : vector<1x16x256xf32> to vector<16x256xf32>
    %185 = vector.shape_cast %182 : vector<16x256xf32> to vector<1x16x256xf32>
    tpu.vector_store %arg8[%c0_75, %c0_76, %c0_77], %185 {strides = array<i32>} : memref<1x16x256xf32, #tpu.memory_space<vmem>>, vector<1x16x256xf32>,
    return
  }
  func.func @transform_0(%arg0: i32) -> (i32, i32, i32) {
    %c0_i32 = arith.constant 0 : i32
    %c0_i32_0 = arith.constant 0 : i32
    %c0_i32_1 = arith.constant 0 : i32
    return %arg0, %c0_i32, %c0_i32_0 : i32, i32, i32
  }
  func.func @transform_1(%arg0: i32) -> (i32, i32) {
    %c0_i32 = arith.constant 0 : i32
    %c0_i32_0 = arith.constant 0 : i32
    %c0_i32_1 = arith.constant 0 : i32
    return %c0_i32, %c0_i32_0 : i32, i32
  }
  func.func @transform_2(%arg0: i32) -> (i32, i32) {
    %c0_i32 = arith.constant 0 : i32
    %c0_i32_0 = arith.constant 0 : i32
    %c0_i32_1 = arith.constant 0 : i32
    return %c0_i32, %c0_i32_0 : i32, i32
  }
  func.func @transform_3(%arg0: i32) -> (i32, i32) {
    %c0_i32 = arith.constant 0 : i32
    %c0_i32_0 = arith.constant 0 : i32
    %c0_i32_1 = arith.constant 0 : i32
    return %c0_i32, %c0_i32_0 : i32, i32
  }
  func.func @transform_4(%arg0: i32) -> (i32, i32) {
    %c0_i32 = arith.constant 0 : i32
    %c0_i32_0 = arith.constant 0 : i32
    %c0_i32_1 = arith.constant 0 : i32
    return %c0_i32, %c0_i32_0 : i32, i32
  }
  func.func @transform_5(%arg0: i32) -> (i32, i32) {
    %c0_i32 = arith.constant 0 : i32
    %c0_i32_0 = arith.constant 0 : i32
    %c0_i32_1 = arith.constant 0 : i32
    return %c0_i32, %c0_i32_0 : i32, i32
  }
  func.func @transform_6(%arg0: i32) -> (i32, i32) {
    %c0_i32 = arith.constant 0 : i32
    %c0_i32_0 = arith.constant 0 : i32
    %c0_i32_1 = arith.constant 0 : i32
    return %c0_i32, %c0_i32_0 : i32, i32
  }
  func.func @transform_7(%arg0: i32) -> (i32, i32, i32) {
    %c0_i32 = arith.constant 0 : i32
    %c0_i32_0 = arith.constant 0 : i32
    %c0_i32_1 = arith.constant 0 : i32
    return %arg0, %c0_i32, %c0_i32_0 : i32, i32, i32
  }
}

</mosaic_0001>

<bundles_post_ra>
// kernel: upsample_gn_forward.1
= control target key start
LH: loop header
LB: loop body
LE: loop exit
PB: predicated region body
PF: predicated region fallthrough
CT: control target
= control target key end

     0   :  { %s1524_s24 = smov 0   ;;  %s1892_s0 = inlined_call_operand.vmem [shape: bf16[2,16,256], index: 0, kind: input, shape index: {}]   ;;  %s1893_s1 = inlined_call_operand.vmem [shape: bf16[16,256], index: 1, kind: input, shape index: {}]   ;;  %s1894_s2 = inlined_call_operand.vmem [shape: bf16[16,256], index: 2, kind: input, shape index: {}]   ;;  %s1895_s3 = inlined_call_operand.vmem [shape: f32[16,4], index: 3, kind: input, shape index: {}]   ;;  %s1896_s4 = inlined_call_operand.vmem [shape: f32[16,4], index: 4, kind: input, shape index: {}]   ;;  %s1897_s5 = inlined_call_operand.vmem [shape: f32[16,16], index: 5, kind: input, shape index: {}]   ;;  %s1898_s6 = inlined_call_operand.vmem [shape: bf16[9,256], index: 6, kind: input, shape index: {}]   ;;  %s1899_s7 = inlined_call_operand.vmem [shape: f32[2,16,256], index: 7, kind: output, shape index: {}]  }
   0x1 LB: > { %s1351_s25 = sadd.s32 4294967295, %s1470_s24   ;;  %p1355_p0 = scmp.ge.s32.totalorder %s1470_s24, 1  ;;  %s1470_s24 = sphi %s1524_s24, %s17_s24  }
   0x2   : > { %p237_p1 = scmp.lt.s32.totalorder %s1470_s24, 3 }
   0x4   : > { %p238_p2 = pnand %p1355_p0, %p237_p1 }
   0x5   : > { %p269_p3 = scmp.lt.s32.totalorder (!%p238_p2), %s1351_s25, 1  ;;  %v311_v0 = vlaneseq (!%p238_p2)  ;;  %v414_v3 = vld [vmem:[%s1898_s6] sm:$0x44] (!%p238_p2)  ;;  %s1472_s9 = smov (!%p238_p2), 16   ;;  %v1597_v21 = vld [vmem:[%s1895_s3 + $0x8] sm:$0xff] (!%p238_p2)  ;;  %v1480_v22 = vmov (!%p238_p2), 0  }
   0x6   : > { %241 = sbr.rel (%p238_p2) target bundleno = 2060 (0x80c), region = 48  ;;  %s1473_s10 = smov (!%p238_p2), 17   ;;  %v1545_v7 = vcombine.low (!%p238_p2), %v414_v3, %v414_v3  ;;  %v1547_v8 = vcombine.high (!%p238_p2), %v414_v3, %v414_v3  ;;  %v1452_v19 = vld [vmem:[%s1893_s1 + $0x4] ss:$8 sps:$4 sm:$0xff] (!%p238_p2)   ;;  %1427 = vset.pattern.permute.xlu0 (!%p238_p2), %v1480_v22  ;;  %1428 = vset.pattern.permute.xlu1 (!%p238_p2), %v1480_v22  ;;  %vm328_vm0 = vcmask (!%p238_p2), 130048   ;;  %vm294_vm1 = vcmask (!%p238_p2), 138240  }
   0x7   : > { %v1541_v5 = vshrl.u32 (!%p238_p2), %v311_v0, 7  ;;  %s1474_s11 = smov (!%p238_p2), 15   ;;  %s1475_s12 = smov (!%p238_p2), 1   ;;  %632 = vmatprep.mubr.bf16.mxu0 (!%p238_p2), %v1452_v19  ;;  %v1592_v20 = vld [vmem:[%s1895_s3] sm:$0xff] (!%p238_p2)  ;;  %vm356_vm2 = vcmask (!%p238_p2), 121856   ;;  %vm390_vm3 = vcmask (!%p238_p2), 7168  }
   0x8   : > { %v421_v10 = vpack.i.b16 (!%p238_p2), %v1545_v7, %v1545_v7  ;;  %v428_v11 = vpack.i.b16 (!%p238_p2), %v1547_v8, %v1547_v8  ;;  %s1476_s13 = smov (!%p238_p2), 127   ;;  %s1477_s14 = smov (!%p238_p2), 113   ;;  %v302_v23 = vld [vmem:[%s1898_s6] sm:$0x11] (!%p238_p2)  ;;  %v364_v26 = vld [vmem:[%s1898_s6] sm:$0x22] (!%p238_p2) }
   0x9   : > { %v1550_v9 = vsub.s32 (!%p238_p2), 2, %v1541_v5  ;;  %s1478_s15 = smov (!%p238_p2), 112   ;;  %s1479_s18 = smov (!%p238_p2), 111   ;;  %v1363_v24 = vcombine.high (!%p238_p2), %v302_v23, %v302_v23  ;;  %v1362_v25 = vcombine.low (!%p238_p2), %v302_v23, %v302_v23  ;;  %v1610_v28 = vsub.s32 (!%p238_p2), 0, %v1541_v5  ;;  %v482_v3 = vld [vmem:[%s1898_s6] sm:$0x88] (!%p238_p2) }
   0xa   : > { %v1365_v31 = vcombine.high (!%p238_p2), %v364_v26, %v364_v26  ;;  %v1364_v36 = vcombine.low (!%p238_p2), %v364_v26, %v364_v26  ;;  %v375_v37 = vsub.s32 (!%p238_p2), 1, %v1541_v5  ;;  %vm446_vm4 = vcmask (!%p238_p2), 1039360  }
   0xb   : > { %v1559_v12 = vrot.slane (!%p238_p2), %v421_v10, %v1550_v9  ;;  %v1562_v13 = vrot.slane (!%p238_p2), %v428_v11, %v1550_v9  ;;  %v343_v27 = vshrl.u32 (!%p238_p2), %v1363_v24, 16  ;;  %v316_v29 = vpack.i.b16 (!%p238_p2), %v1363_v24, %v1363_v24 }
   0xc   : > { %v309_v30 = vpack.i.b16 (!%p238_p2), %v1362_v25, %v1362_v25  ;;  %v336_v32 = vshrl.u32 (!%p238_p2), %v1362_v25, 16  ;;  %v378_v40 = vpack.i.b16 (!%p238_p2), %v1365_v31, %v1365_v31  ;;  %v405_v41 = vshrl.u32 (!%p238_p2), %v1365_v31, 16 }
   0xd   : > { %s1901_s25 = smov (!%p269_p3, %s1351_s25), 1  ;;  %v1368_v14 = vcombine.low %v1559_v12, %v1562_v13  ;;  %v344_v35 = vpack.i.b16 %v343_v27, %v343_v27  ;;  %v1614_v38 = vrot.slane %v316_v29, %v1610_v28  ;;  %v371_v46 = vpack.i.b16 %v1364_v36, %v1364_v36 }
   0xe   : > { %s1389_s26 = sshll.u32 %s1901_s25, 4  ;;  %v1617_v39 = vrot.slane %v309_v30, %v1610_v28  ;;  %v337_v42 = vpack.i.b16 %v336_v32, %v336_v32  ;;  %v398_v50 = vshrl.u32 %v1364_v36, 16  ;;  %v1627_v53 = vrot.slane %v378_v40, %v375_v37 }
   0xf   : > { %s273_s29 = scalar_lea.vmem %s1892_s0, %s1389_s26  ;;  %v1620_v43 = vrot.slane %v344_v35, %v1610_v28  ;;  %v406_v54 = vpack.i.b16 %v405_v41, %v405_v41  ;;  %v1634_v60 = vrot.slane %v371_v46, %v375_v37  ;;  %v454_v11 = vshrl.u32 %v1545_v7, 16 }
  0x10   : > { %v280_v1 = vld [vmem:[%s273_s29] sm:$0xff]  ;;  %v281_v2 = vld [vmem:[%s273_s29 + $0x8] sm:$0xff]  ;;  %v1630_v55 = vrot.slane %v337_v42, %v1610_v28  ;;  %v399_v62 = vpack.i.b16 %v398_v50, %v398_v50  ;;  %v1370_v24 = vcombine.high %v482_v3, %v482_v3  ;;  %v1369_v31 = vcombine.low %v482_v3, %v482_v3 }
  0x11   : > { %v1360_v4 = vcombine.high %v280_v1, %v281_v2  ;;  %v1361_v6 = vcombine.low %v280_v1, %v281_v2  ;;  %v1568_v15 = vmul.bf16 %v1368_v14, %v280_v1  ;;  %v1570_v16 = vmul.bf16 %v1368_v14, %v281_v2 }
  0x12   : > { %v1639_v1 = vrot.slane %v406_v54, %v375_v37  ;;  %v461_v2 = vshrl.u32 %v1547_v8, 16  ;;  %v1648_v19 = vrot.slane %v399_v62, %v375_v37  ;;  %v455_v29 = vpack.i.b16 %v454_v11, %v454_v11  ;;  %v544_v37 = vld [vmem:[%s1898_s6 + $0x8] sm:$0x11] }
  0x13   : > { %324 = vrot.lane.b32.xlu1 %v1360_v4, %s1472_s9  ;;  %287 = vrot.lane.b32.xlu0 %v1360_v4, %s1473_s10  ;;  %v1374_v17 = vcombine.high %v1568_v15, %v1570_v16  ;;  %v1373_v18 = vcombine.low %v1568_v15, %v1570_v16  ;;  %v493_v32 = vsub.s32 3, %v1541_v5  ;;  %v523_v35 = vshrl.u32 %v1370_v24, 16 }
  0x14   : > { %v462_v26 = vpack.i.b16 %v461_v2, %v461_v2  ;;  %vm474_vm5 = vcmask 924672   ;;  %v1663_v42 = vrot.slane %v455_v29, %v1550_v9  ;;  %v489_v5 = vpack.i.b16 %v1369_v31, %v1369_v31 }
  0x15   : > { %vm508_vm6 = vcmask 916480   ;;  %vm536_vm7 = vcmask 908288  }
  0x16   : > { %v1677_v54 = vrot.slane %v489_v5, %v493_v32 }
  0x17   : > { %326 = vrot.lane.b32.xlu1 %v1361_v6, %s1472_s9  ;;  %292 = vrot.lane.b32.xlu0 %v1361_v6, %s1473_s10 }
  0x1b   : > { %354 = vrot.lane.b32.xlu1 %v1361_v6, %s1474_s11  ;;  %352 = vrot.lane.b32.xlu0 %v1360_v4, %s1474_s11 }
  0x1f   : > { %388 = vrot.lane.b32.xlu1 %v1361_v6, %s1475_s12  ;;  %386 = vrot.lane.b32.xlu0 %v1360_v4, %s1475_s12 }
  0x23   : > { %444 = vrot.lane.b32.xlu1 %v1360_v4, %s1476_s13  ;;  %442 = vrot.lane.b32.xlu0 %v1361_v6, %s1476_s13 }
  0x27   : > { %472 = vrot.lane.b32.xlu1 %v1360_v4, %s1477_s14  ;;  %470 = vrot.lane.b32.xlu0 %v1361_v6, %s1477_s14 }
  0x2b   : > { %506 = vrot.lane.b32.xlu1 %v1360_v4, %s1478_s15  ;;  %504 = vrot.lane.b32.xlu0 %v1361_v6, %s1478_s15 }
  0x2f   : > { %534 = vrot.lane.b32.xlu1 %v1360_v4, %s1479_s18  ;;  %532 = vrot.lane.b32.xlu0 %v1361_v6, %s1479_s18 }
  0x33   : > { %582 = vperm.xlu0 %1427, %v1592_v20   ;;  %587 = vperm.xlu1 %1428, %v1597_v21  }
  0x85   : > { %v325_v33 = vpop.permute.xlu1 %324  ;;  %v288_v34 = vpop.permute.xlu0 %287 }
  0x89   : > { %v327_v44 = vpop.permute.xlu1 %326  ;;  %v293_v45 = vpop.permute.xlu0 %292 }
  0x8a   : > { %v329_v47 = vsel %vm328_vm0, %v327_v44, %v325_v33  ;;  %v300_v48 = vsel %vm294_vm1, %v288_v34, %v293_v45  ;;  %v295_v49 = vsel %vm294_vm1, %v293_v45, %v288_v34  ;;  %v334_v56 = vsel %vm328_vm0, %v325_v33, %v327_v44 }
  0x8b   : > { %v323_v51 = vmul.bf16 %v1614_v38, %v295_v49  ;;  %v322_v52 = vmul.bf16 %v1617_v39, %v300_v48  ;;  %v351_v57 = vmul.bf16 %v1620_v43, %v329_v47  ;;  %v350_v4 = vmul.bf16 %v1630_v55, %v334_v56 }
  0x8c   : > { %v496_v33 = vpack.i.b16 %v1370_v24, %v1370_v24  ;;  %v1656_v34 = vrot.slane %v462_v26, %v1550_v9  ;;  %v516_v45 = vshrl.u32 %v1369_v31, 16  ;;  %v524_v48 = vpack.i.b16 %v523_v35, %v523_v35 }
  0x8d   : > { %600 = vmatprep.subr.bf16.mxu0 %v323_v51  ;;  %v355_v58 = vpop.permute.xlu1 %354  ;;  %v353_v59 = vpop.permute.xlu0 %352  ;;  %v1372_v49 = vcombine.high %v544_v37, %v544_v37  ;;  %v1371_v56 = vcombine.low %v544_v37, %v544_v37 }
  0x8e   : > { %601 = vmatpush1.bf16.msra.mxu0 %v322_v52  ;;  %v357_v61 = vsel %vm356_vm2, %v355_v58, %v353_v59  ;;  %v362_v63 = vsel %vm356_vm2, %v353_v59, %v355_v58  ;;  %v1665_v44 = vrot.slane %v496_v33, %v493_v32  ;;  %v1681_v59 = vrot.slane %v524_v48, %v493_v32 }
  0x8f   : > { %602 = vmatprep.subr.bf16.mxu0 %v351_v57  ;;  %v385_v0 = vmul.bf16 %v1627_v53, %v357_v61  ;;  %v384_v14 = vmul.bf16 %v1634_v60, %v362_v63  ;;  %v558_v61 = vpack.i.b16 %v1372_v49, %v1372_v49  ;;  %v1736_v49 = vld [vmem:[%s1897_s5 + $0x8] sm:$0xff] }
  0x91   : > { %v389_v6 = vpop.permute.xlu1 %388  ;;  %v387_v10 = vpop.permute.xlu0 %386 }
  0x92   : > { %603 = vmatpush1.bf16.msra.mxu0 %v350_v4  ;;  %v391_v23 = vsel %vm390_vm3, %v389_v6, %v387_v10  ;;  %v396_v8 = vsel %vm390_vm3, %v387_v10, %v389_v6  ;;  %v1690_v4 = vrot.slane %v558_v61, %v1610_v28 }
  0x93   : > { %604 = vmatprep.subr.bf16.mxu0 %v385_v0  ;;  %v413_v25 = vmul.bf16 %v1639_v1, %v391_v23  ;;  %v412_v7 = vmul.bf16 %v1648_v19, %v396_v8  ;;  %v1450_v8 = vld [vmem:[%s1893_s1] ss:$8 sps:$4 sm:$0xff]  }
  0x95   : > { %v445_v27 = vpop.permute.xlu1 %444  ;;  %v443_v30 = vpop.permute.xlu0 %442 }
  0x96   : > { %605 = vmatpush1.bf16.msra.mxu0 %v384_v14  ;;  %v452_v36 = vsel %vm446_vm4, %v445_v27, %v443_v30  ;;  %v447_v46 = vsel %vm446_vm4, %v443_v30, %v445_v27 }
  0x97   : > { %606 = vmatprep.subr.bf16.mxu0 %v413_v25  ;;  %v469_v47 = vmul.bf16 %v1656_v34, %v452_v36  ;;  %v468_v52 = vmul.bf16 %v1663_v42, %v447_v46  ;;  %v1481_v25 = vmov 0.0  }
  0x98   : > { %715 = vmatprep.mubr.f32.mxu1 %v1481_v25 }
  0x99   : > { %v473_v40 = vpop.permute.xlu1 %472  ;;  %v471_v41 = vpop.permute.xlu0 %470 }
  0x9a   : > { %607 = vmatpush1.bf16.msra.mxu0 %v412_v7  ;;  %v480_v50 = vsel %vm474_vm5, %v473_v40, %v471_v41  ;;  %v475_v57 = vsel %vm474_vm5, %v471_v41, %v473_v40 }
  0x9b   : > { %608 = vmatprep.subr.bf16.mxu0 %v1374_v17  ;;  %v517_v17 = vpack.i.b16 %v516_v45, %v516_v45  ;;  %v503_v58 = vmul.bf16 %v1665_v44, %v480_v50  ;;  %v502_v15 = vmul.bf16 %v1677_v54, %v475_v57 }
  0x9d   : > { %v507_v51 = vpop.permute.xlu1 %506  ;;  %v505_v9 = vpop.permute.xlu0 %504  ;;  %v1685_v16 = vrot.slane %v517_v17, %v493_v32 }
  0x9e   : > { %609 = vmatpush1.bf16.msra.mxu0 %v1373_v18  ;;  %v514_v62 = vsel %vm508_vm6, %v507_v51, %v505_v9  ;;  %v551_v18 = vpack.i.b16 %v1371_v56, %v1371_v56  ;;  %v509_v2 = vsel %vm508_vm6, %v505_v9, %v507_v51 }
  0x9f   : > { %610 = vmatprep.subr.bf16.mxu0 %v469_v47  ;;  %v531_v3 = vmul.bf16 %v1681_v59, %v514_v62  ;;  %v530_v10 = vmul.bf16 %v1685_v16, %v509_v2  ;;  %v1728_v47 = vld [vmem:[%s1897_s5] sm:$0xff] }
  0xa0   : > { %v1695_v11 = vrot.slane %v551_v18, %v1610_v28 }
  0xa1   : > { %v535_v63 = vpop.permute.xlu1 %534  ;;  %v533_v0 = vpop.permute.xlu0 %532 }
  0xa2   : > { %611 = vmatpush1.bf16.msra.mxu0 %v468_v52  ;;  %v542_v6 = vsel %vm536_vm7, %v535_v63, %v533_v0  ;;  %v537_v14 = vsel %vm536_vm7, %v533_v0, %v535_v63 }
  0xa3   : > { %612 = vmatprep.subr.bf16.mxu0 %v503_v58  ;;  %v565_v23 = vmul.bf16 %v1690_v4, %v542_v6  ;;  %v564_v24 = vmul.bf16 %v1695_v11, %v537_v14 }
  0xa6   : > { %613 = vmatpush1.bf16.msra.mxu0 %v502_v15  ;;  %v1482_v15 = vmov 1  }
  0xa7   : > { %614 = vmatprep.subr.bf16.mxu0 %v531_v3  ;;  %1430 = vset.pattern.permute.xlu0 %v1482_v15 }
  0xa8   : > { %1429 = vset.pattern.permute.xlu1 %v1482_v15 }
  0xaa   : > { %615 = vmatpush1.bf16.msra.mxu0 %v530_v10 }
  0xab   : > { %616 = vmatprep.subr.bf16.mxu0 %v565_v23 }
  0xae   : > { %617 = vmatpush1.bf16.msra.mxu0 %v564_v24 }
  0xb1   : > { %633 = vmatmul.mubr.bf16.vlgmr.msra.gmra.mrb[0].mxu0 %v1450_v8 }
  0xb2   : > { %1120 = vmatprep.mubr.f32.mxu0 %v1481_v25  ;;  %v583_v28 = vpop.permute.xlu0 %582  ;;  %v588_v27 = vpop.permute.xlu1 %587 }
 0x184   : > { %v634_v26 = vpop.f32.mrb[0].mxu0 }
 0x185   : > { %v636_v29 = vpop.f32.mrb[1].mxu0  ;;  %v1711_v35 = vadd.f32 %v634_v26, %v583_v28 }
 0x186   : > { %v1705_v30 = vadd.f32 %v636_v29, %v583_v28  ;;  %v638_v7 = vpop.f32.mrb[2].mxu0 }
 0x187   : > { %v1707_v31 = vadd.f32 %v638_v7, %v588_v27  ;;  %v640_v32 = vpop.f32.mrb[3].mxu0  ;;  %v728_v46 = vmul.f32 %v1711_v35, %v1711_v35 }
 0x188   : > { %v1709_v33 = vadd.f32 %v640_v32, %v588_v27  ;;  %v729_v36 = vmul.f32 %v1705_v30, %v1705_v30 }
 0x189   : > { %v730_v41 = vmul.f32 %v1707_v31, %v1707_v31  ;;  %v1393_v5 = vpack.c.bf16 %v1707_v31, %v1711_v35 }
 0x18a   : > { %v731_v37 = vmul.f32 %v1709_v33, %v1709_v33  ;;  %v1391_v40 = vpack.c.bf16 %v1709_v33, %v1705_v30 }
 0x18b   : > { %v1397_v48 = vpack.c.bf16 %v730_v41, %v728_v46 }
 0x18c   : > { %1392 = vmatprep.subr.bf16.mxu1 %v1391_v40  ;;  %v1395_v45 = vpack.c.bf16 %v731_v37, %v729_v36 }
 0x18d   : > { %1394 = vmatpush1.bf16.msra.mxu1 %v1393_v5 }
 0x18e   : > { %1396 = vmatprep.subr.bf16.mxu1 %v1395_v45  ;;  %v1483_v45 = vmov 2  }
 0x190   : > { %1377 = vmatmul.mubr.msk.f32.vlgmr.msra.gmra.mrb[0].mxu1 %vm328_vm0, %v1728_v47 }
 0x191   : > { %1398 = vmatpush1.bf16.msra.mxu1 %v1397_v48  ;;  %721 = vmatprep.mubr.f32.mxu1 %v1481_v25 }
 0x194   : > { %1378 = vmatmul.mubr.msk.f32.gmra.mrb[2].mxu1 %vm328_vm0, %v1736_v49 }
 0x195   : > { %796 = vmatprep.mubr.f32.mxu1 %v1481_v25 }
 0x198   : > { %1379 = vmatmul.mubr.msk.f32.vlgmr.msra.gmra.mrb[4].mxu1 %vm328_vm0, %v1728_v47 }
 0x199   : > { %802 = vmatprep.mubr.f32.mxu1 %v1481_v25 }
 0x19c   : > { %1380 = vmatmul.mubr.msk.f32.gmra.mrb[6].mxu1 %vm328_vm0, %v1736_v49 }
 0x263   : > { %v717_v50 = vpop.f32.mrb[0].mxu1 }
 0x264   : > { %v719_v51 = vpop.f32.mrb[1].mxu1 }
 0x265   : > { %v809_v9 = vadd.f32 %v719_v51, %v717_v50 }
 0x267   : > { %810 = vadd.xlane.f32.xlu1 %v809_v9  ;;  %v723_v52 = vpop.f32.mrb[2].mxu1 }
 0x268   : > { %v725_v17 = vpop.f32.mrb[3].mxu1 }
 0x269   : > { %v812_v56 = vadd.f32 %v725_v17, %v723_v52 }
 0x26b   : > { %813 = vadd.xlane.f32.xlu0 %v812_v56  ;;  %v798_v57 = vpop.f32.mrb[4].mxu1 }
 0x26c   : > { %v800_v58 = vpop.f32.mrb[5].mxu1 }
 0x26d   : > { %v817_v61 = vadd.f32 %v800_v58, %v798_v57 }
 0x26f   : > { %818 = vadd.xlane.f32.xlu0 %v817_v61  ;;  %v804_v62 = vpop.f32.mrb[6].mxu1 }
 0x270   : > { %v806_v63 = vpop.f32.mrb[7].mxu1 }
 0x271   : > { %v820_v0 = vadd.f32 %v806_v63, %v804_v62 }
 0x273   : > { %821 = vadd.xlane.f32.xlu1 %v820_v0 }
 0x2f4   : > { %v811_v18 = vpop.xlane.xlu1 %810 }
 0x2f5   : > { %v815_v3 = vmul.f32 0.001953125, %v811_v18 }
 0x2f7   : > { %v825_v10 = vmul.f32 %v815_v3, %v815_v3 }
 0x2f8   : > { %v814_v2 = vpop.xlane.xlu0 %813 }
 0x2f9   : > { %v816_v14 = vmul.f32 0.001953125, %v814_v2 }
 0x2fb   : > { %v826_v28 = vmul.f32 %v816_v14, %v816_v14 }
 0x2fc   : > { %v819_v6 = vpop.xlane.xlu0 %818 }
 0x2fd   : > { %v823_v23 = vmul.f32 0.001953125, %v819_v6 }
 0x2ff   : > { %v827_v24 = vsub.f32 %v823_v23, %v825_v10  ;;  %v1793_v23 = vld [vmem:[%s1896_s4] sm:$0xff] }
 0x300   : > { %v822_v8 = vpop.xlane.xlu1 %821 }
 0x301   : > { %v829_v26 = vadd.f32 1e-05, %v827_v24  ;;  %v824_v27 = vmul.f32 0.001953125, %v822_v8  ;;  %v1798_v24 = vld [vmem:[%s1896_s4 + $0x8] sm:$0xff] }
 0x303   : > { %1456 = vrsqrt.f32 %v829_v26  ;;  %v828_v29 = vsub.f32 %v824_v27, %v826_v28 }
 0x305   : > { %v830_v7 = vadd.f32 1e-05, %v828_v29 }
 0x307   : > { %1458 = vrsqrt.f32 %v830_v7 }
 0x30d   : > { %v1457_v32 = vpop.eup %1456 }
 0x30e   : > { %v833_v36 = vmul.f32 %v1457_v32, %v1592_v20 }
 0x310   : > { %v849_v37 = vmul.f32 %v833_v36, %v815_v3 }
 0x311   : > { %v1459_v40 = vpop.eup %1458 }
 0x312   : > { %853 = vrot.lane.b32.xlu0 %v849_v37, %s1475_s12  ;;  %v834_v41 = vmul.f32 %v1459_v40, %v1597_v21 }
 0x314   : > { %v850_v5 = vmul.f32 %v834_v41, %v816_v14 }
 0x316   : > { %842 = vperm.xlu0 %1430, %v834_v41   ;;  %855 = vrot.lane.b32.xlu1 %v850_v5, %s1475_s12 }
 0x31a   : > { %837 = vperm.xlu1 %1429, %v833_v36   ;;  %1432 = vset.pattern.permute.xlu0 %v1480_v22 }
 0x31e   : > { %1431 = vset.pattern.permute.xlu1 %v1483_v45 }
 0x384   : > { %v854_v46 = vpop.permute.xlu0 %853 }
 0x385   : > { %v859_v48 = vsub.f32 %v1592_v20, %v854_v46 }
 0x387   : > { %863 = vperm.xlu1 %1431, %v859_v48  }
 0x388   : > { %v856_v50 = vpop.permute.xlu1 %855 }
 0x389   : > { %v860_v51 = vsub.f32 %v1597_v21, %v856_v50 }
 0x38b   : > { %868 = vperm.xlu1 %1431, %v860_v51  }
 0x38f   : > { %1433 = vset.pattern.permute.xlu1 %v1480_v22 }
 0x395   : > { %v843_v56 = vpop.permute.xlu0 %842 }
 0x396   : > { %v847_v62 = vmul.f32 %v843_v56, %v1707_v31  ;;  %v848_v20 = vmul.f32 %v843_v56, %v1709_v33  ;;  %v1455_v33 = vld [vmem:[%s1894_s2 + $0x4] ss:$8 sps:$4 sm:$0xff]  }
 0x397   : > { %1045 = vmatprep.mubr.bf16.mxu1 %v1455_v33 }
 0x399   : > { %v838_v9 = vpop.permute.xlu1 %837 }
 0x39a   : > { %v845_v52 = vmul.f32 %v838_v9, %v1711_v35  ;;  %v846_v17 = vmul.f32 %v838_v9, %v1705_v30 }
 0x406   : > { %v864_v57 = vpop.permute.xlu1 %863 }
 0x407   : > { %v871_v58 = vadd.f32 %v864_v57, %v845_v52  ;;  %v872_v61 = vadd.f32 %v864_v57, %v846_v17 }
 0x409   : > { %v879_v0 = vmul.f32 0.01, %v871_v58  ;;  %v880_v18 = vmul.f32 0.01, %v872_v61  ;;  %vm875_vm8 = vcmp.ge.f32.partialorder %v871_v58, 0.0  ;;  %vm876_vm9 = vcmp.ge.f32.partialorder %v872_v61, 0.0 }
 0x40a   : > { %v869_v63 = vpop.permute.xlu1 %868 }
 0x40b   : > { %v873_v21 = vadd.f32 %v869_v63, %v847_v62  ;;  %v874_v2 = vadd.f32 %v869_v63, %v848_v20  ;;  %v883_v30 = vsel %vm875_vm8, %v871_v58, %v879_v0  ;;  %v884_v3 = vsel %vm876_vm9, %v872_v61, %v880_v18 }
 0x40d   : > { %vm877_vm10 = vcmp.ge.f32.partialorder %v873_v21, 0.0  ;;  %vm878_vm11 = vcmp.ge.f32.partialorder %v874_v2, 0.0  ;;  %v881_v22 = vmul.f32 0.01, %v873_v21  ;;  %v882_v35 = vmul.f32 0.01, %v874_v2 }
 0x40f   : > { %v885_v6 = vsel %vm877_vm10, %v873_v21, %v881_v22  ;;  %v886_v10 = vsel %vm878_vm11, %v874_v2, %v882_v35 }
 0x410   : > { %v1761_v14 = vpack.c.bf16 %v885_v6, %v883_v30  ;;  %v888_v31 = vpack.c.bf16 %v886_v10, %v884_v3 }
 0x412   : > { %890 = vrot.lane.b32.xlu0 %v888_v31, %s1473_s10  ;;  %893 = vrot.lane.b32.xlu1 %v1761_v14, %s1473_s10  ;;  %v940_v58 = vmul.bf16 %v888_v31, %v1562_v13 }
 0x416   : > { %903 = vrot.lane.b32.xlu0 %v888_v31, %s1472_s9  ;;  %905 = vrot.lane.b32.xlu1 %v1761_v14, %s1472_s9 }
 0x41a   : > { %915 = vrot.lane.b32.xlu0 %v888_v31, %s1474_s11  ;;  %917 = vrot.lane.b32.xlu1 %v1761_v14, %s1474_s11 }
 0x41e   : > { %927 = vrot.lane.b32.xlu0 %v888_v31, %s1475_s12  ;;  %929 = vrot.lane.b32.xlu1 %v1761_v14, %s1475_s12 }
 0x422   : > { %941 = vrot.lane.b32.xlu0 %v1761_v14, %s1476_s13  ;;  %943 = vrot.lane.b32.xlu1 %v888_v31, %s1476_s13 }
 0x426   : > { %953 = vrot.lane.b32.xlu0 %v1761_v14, %s1477_s14  ;;  %955 = vrot.lane.b32.xlu1 %v888_v31, %s1477_s14 }
 0x42a   : > { %965 = vrot.lane.b32.xlu0 %v1761_v14, %s1478_s15  ;;  %967 = vrot.lane.b32.xlu1 %v888_v31, %s1478_s15 }
 0x42e   : > { %977 = vrot.lane.b32.xlu0 %v1761_v14, %s1479_s18  ;;  %979 = vrot.lane.b32.xlu1 %v888_v31, %s1479_s18 }
 0x432   : > { %995 = vperm.xlu0 %1432, %v1793_v23   ;;  %1000 = vperm.xlu1 %1433, %v1798_v24  }
 0x436   : > { %1435 = vset.pattern.permute.xlu0 %v1482_v15  ;;  %1434 = vset.pattern.permute.xlu1 %v1482_v15 }
 0x484   : > { %v891_v8 = vpop.permute.xlu0 %890  ;;  %v894_v28 = vpop.permute.xlu1 %893 }
 0x485   : > { %v895_v26 = vsel %vm294_vm1, %v894_v28, %v891_v8  ;;  %v899_v27 = vsel %vm294_vm1, %v891_v8, %v894_v28 }
 0x486   : > { %v901_v29 = vmul.bf16 %v899_v27, %v1617_v39  ;;  %v902_v7 = vmul.bf16 %v895_v26, %v1614_v38 }
 0x488   : > { %v904_v32 = vpop.permute.xlu0 %903  ;;  %1013 = vmatprep.subr.bf16.mxu1 %v902_v7  ;;  %v906_v36 = vpop.permute.xlu1 %905 }
 0x489   : > { %v907_v37 = vsel %vm328_vm0, %v906_v36, %v904_v32  ;;  %v911_v40 = vsel %vm328_vm0, %v904_v32, %v906_v36  ;;  %1014 = vmatpush1.bf16.msra.mxu1 %v901_v29 }
 0x48a   : > { %v913_v15 = vmul.bf16 %v911_v40, %v1630_v55  ;;  %v914_v41 = vmul.bf16 %v907_v37, %v1620_v43 }
 0x48c   : > { %v916_v5 = vpop.permute.xlu0 %915  ;;  %1015 = vmatprep.subr.bf16.mxu1 %v914_v41  ;;  %v918_v46 = vpop.permute.xlu1 %917 }
 0x48d   : > { %v919_v48 = vsel %vm356_vm2, %v918_v46, %v916_v5  ;;  %v923_v39 = vsel %vm356_vm2, %v916_v5, %v918_v46  ;;  %1016 = vmatpush1.bf16.msra.mxu1 %v913_v15 }
 0x48e   : > { %v925_v38 = vmul.bf16 %v923_v39, %v1634_v60  ;;  %v926_v50 = vmul.bf16 %v919_v48, %v1627_v53  ;;  %v939_v53 = vmul.bf16 %v1761_v14, %v1559_v12 }
 0x490   : > { %v928_v51 = vpop.permute.xlu0 %927  ;;  %1017 = vmatprep.subr.bf16.mxu1 %v926_v50  ;;  %v930_v9 = vpop.permute.xlu1 %929 }
 0x491   : > { %v931_v52 = vsel %vm390_vm3, %v930_v9, %v928_v51  ;;  %v935_v55 = vsel %vm390_vm3, %v928_v51, %v930_v9  ;;  %1018 = vmatpush1.bf16.msra.mxu1 %v925_v38 }
 0x492   : > { %v937_v43 = vmul.bf16 %v935_v55, %v1648_v19  ;;  %v938_v17 = vmul.bf16 %v931_v52, %v1639_v1 }
 0x494   : > { %v942_v56 = vpop.permute.xlu0 %941  ;;  %1019 = vmatprep.subr.bf16.mxu1 %v938_v17  ;;  %v944_v57 = vpop.permute.xlu1 %943 }
 0x495   : > { %v949_v60 = vsel %vm446_vm4, %v944_v57, %v942_v56  ;;  %1020 = vmatpush1.bf16.msra.mxu1 %v937_v43  ;;  %v945_v61 = vsel %vm446_vm4, %v942_v56, %v944_v57 }
 0x496   : > { %1021 = vmatprep.subr.bf16.mxu1 %v940_v58  ;;  %v952_v62 = vmul.bf16 %v949_v60, %v1656_v34  ;;  %v951_v63 = vmul.bf16 %v945_v61, %v1663_v42 }
 0x498   : > { %v954_v20 = vpop.permute.xlu0 %953  ;;  %v956_v19 = vpop.permute.xlu1 %955 }
 0x499   : > { %v961_v1 = vsel %vm474_vm5, %v956_v19, %v954_v20  ;;  %1022 = vmatpush1.bf16.msra.mxu1 %v939_v53  ;;  %v957_v13 = vsel %vm474_vm5, %v954_v20, %v956_v19 }
 0x49a   : > { %1023 = vmatprep.subr.bf16.mxu1 %v952_v62  ;;  %v964_v0 = vmul.bf16 %v961_v1, %v1665_v44  ;;  %v963_v34 = vmul.bf16 %v957_v13, %v1677_v54 }
 0x49c   : > { %v966_v18 = vpop.permute.xlu0 %965  ;;  %v968_v21 = vpop.permute.xlu1 %967 }
 0x49d   : > { %v973_v12 = vsel %vm508_vm6, %v968_v21, %v966_v18  ;;  %1024 = vmatpush1.bf16.msra.mxu1 %v951_v63  ;;  %v969_v2 = vsel %vm508_vm6, %v966_v18, %v968_v21 }
 0x49e   : > { %1025 = vmatprep.subr.bf16.mxu1 %v964_v0  ;;  %v976_v22 = vmul.bf16 %v973_v12, %v1681_v59  ;;  %v975_v44 = vmul.bf16 %v969_v2, %v1685_v16  ;;  %v1453_v59 = vld [vmem:[%s1894_s2] ss:$8 sps:$4 sm:$0xff]  }
 0x4a0   : > { %v978_v35 = vpop.permute.xlu0 %977  ;;  %v980_v30 = vpop.permute.xlu1 %979 }
 0x4a1   : > { %v985_v42 = vsel %vm536_vm7, %v980_v30, %v978_v35  ;;  %1026 = vmatpush1.bf16.msra.mxu1 %v963_v34  ;;  %v981_v3 = vsel %vm536_vm7, %v978_v35, %v980_v30 }
 0x4a2   : > { %1027 = vmatprep.subr.bf16.mxu1 %v976_v22  ;;  %v988_v6 = vmul.bf16 %v985_v42, %v1690_v4  ;;  %v987_v54 = vmul.bf16 %v981_v3, %v1695_v11 }
 0x4a5   : > { %1028 = vmatpush1.bf16.msra.mxu1 %v975_v44 }
 0x4a6   : > { %1029 = vmatprep.subr.bf16.mxu1 %v988_v6 }
 0x4a9   : > { %1030 = vmatpush1.bf16.msra.mxu1 %v987_v54 }
 0x4ac   : > { %1046 = vmatmul.mubr.bf16.vlgmr.msra.gmra.mrb[8].mxu1 %v1453_v59 }
 0x4b1   : > { %v996_v10 = vpop.permute.xlu0 %995  ;;  %v1001_v31 = vpop.permute.xlu1 %1000 }
 0x57f   : > { %v1047_v14 = vpop.f32.mrb[8].mxu1 }
 0x580   : > { %v1049_v33 = vpop.f32.mrb[9].mxu1  ;;  %v1848_v27 = vadd.f32 %v1047_v14, %v996_v10 }
 0x581   : > { %v1842_v8 = vadd.f32 %v1049_v33, %v996_v10  ;;  %v1051_v16 = vpop.f32.mrb[10].mxu1 }
 0x582   : > { %v1844_v28 = vadd.f32 %v1051_v16, %v1001_v31  ;;  %v1053_v4 = vpop.f32.mrb[11].mxu1  ;;  %v1133_v40 = vmul.f32 %v1848_v27, %v1848_v27 }
 0x583   : > { %v1846_v26 = vadd.f32 %v1053_v4, %v1001_v31  ;;  %v1134_v11 = vmul.f32 %v1842_v8, %v1842_v8 }
 0x584   : > { %v1401_v32 = vpack.c.bf16 %v1844_v28, %v1848_v27  ;;  %v1135_v36 = vmul.f32 %v1844_v28, %v1844_v28 }
 0x585   : > { %v1136_v29 = vmul.f32 %v1846_v26, %v1846_v26  ;;  %v1399_v7 = vpack.c.bf16 %v1846_v26, %v1842_v8 }
 0x586   : > { %v1405_v15 = vpack.c.bf16 %v1135_v36, %v1133_v40 }
 0x587   : > { %1400 = vmatprep.subr.bf16.mxu0 %v1399_v7  ;;  %v1403_v37 = vpack.c.bf16 %v1136_v29, %v1134_v11 }
 0x588   : > { %1402 = vmatpush1.bf16.msra.mxu0 %v1401_v32 }
 0x589   : > { %1404 = vmatprep.subr.bf16.mxu0 %v1403_v37 }
 0x58b   : > { %1383 = vmatmul.mubr.msk.f32.vlgmr.msra.gmra.mrb[4].mxu0 %vm328_vm0, %v1728_v47 }
 0x58c   : > { %1406 = vmatpush1.bf16.msra.mxu0 %v1405_v15  ;;  %1126 = vmatprep.mubr.f32.mxu0 %v1481_v25 }
 0x58f   : > { %1384 = vmatmul.mubr.msk.f32.gmra.mrb[6].mxu0 %vm328_vm0, %v1736_v49 }
 0x590   : > { %1201 = vmatprep.mubr.f32.mxu0 %v1481_v25 }
 0x593   : > { %1385 = vmatmul.mubr.msk.f32.vlgmr.msra.gmra.mrb[8].mxu0 %vm328_vm0, %v1728_v47 }
 0x594   : > { %1207 = vmatprep.mubr.f32.mxu0 %v1481_v25 }
 0x597   : > { %1386 = vmatmul.mubr.msk.f32.gmra.mrb[10].mxu0 %vm328_vm0, %v1736_v49 }
 0x65e   : > { %v1122_v41 = vpop.f32.mrb[4].mxu0 }
 0x65f   : > { %v1124_v5 = vpop.f32.mrb[5].mxu0 }
 0x660   : > { %v1214_v46 = vadd.f32 %v1124_v5, %v1122_v41 }
 0x662   : > { %v1128_v48 = vpop.f32.mrb[6].mxu0  ;;  %1215 = vadd.xlane.f32.xlu1 %v1214_v46 }
 0x663   : > { %v1130_v39 = vpop.f32.mrb[7].mxu0 }
 0x664   : > { %v1217_v38 = vadd.f32 %v1130_v39, %v1128_v48 }
 0x666   : > { %1218 = vadd.xlane.f32.xlu0 %v1217_v38  ;;  %v1203_v50 = vpop.f32.mrb[8].mxu0 }
 0x667   : > { %v1205_v51 = vpop.f32.mrb[9].mxu0 }
 0x668   : > { %v1222_v9 = vadd.f32 %v1205_v51, %v1203_v50 }
 0x66a   : > { %1223 = vadd.xlane.f32.xlu0 %v1222_v9  ;;  %v1209_v52 = vpop.f32.mrb[10].mxu0 }
 0x66b   : > { %v1211_v55 = vpop.f32.mrb[11].mxu0 }
 0x66c   : > { %v1225_v47 = vadd.f32 %v1211_v55, %v1209_v52 }
 0x66e   : > { %1226 = vadd.xlane.f32.xlu1 %v1225_v47 }
 0x6ef   : > { %v1216_v25 = vpop.xlane.xlu1 %1215 }
 0x6f0   : > { %v1220_v17 = vmul.f32 0.001953125, %v1216_v25 }
 0x6f2   : > { %v1230_v56 = vmul.f32 %v1220_v17, %v1220_v17 }
 0x6f3   : > { %v1219_v43 = vpop.xlane.xlu0 %1218 }
 0x6f4   : > { %v1221_v57 = vmul.f32 0.001953125, %v1219_v43 }
 0x6f6   : > { %v1231_v61 = vmul.f32 %v1221_v57, %v1221_v57 }
 0x6f7   : > { %v1224_v49 = vpop.xlane.xlu0 %1223 }
 0x6f8   : > { %v1228_v58 = vmul.f32 0.001953125, %v1224_v49 }
 0x6fa   : > { %v1232_v60 = vsub.f32 %v1228_v58, %v1230_v56 }
 0x6fb   : > { %v1227_v53 = vpop.xlane.xlu1 %1226 }
 0x6fc   : > { %v1234_v62 = vadd.f32 1e-05, %v1232_v60  ;;  %v1229_v20 = vmul.f32 0.001953125, %v1227_v53 }
 0x6fe   : > { %1460 = vrsqrt.f32 %v1234_v62  ;;  %v1233_v19 = vsub.f32 %v1229_v20, %v1231_v61 }
 0x700   : > { %v1235_v1 = vadd.f32 1e-05, %v1233_v19 }
 0x702   : > { %1462 = vrsqrt.f32 %v1235_v1 }
 0x708   : > { %v1461_v63 = vpop.eup %1460 }
 0x709   : > { %v1238_v13 = vmul.f32 %v1461_v63, %v1793_v23 }
 0x70b   : > { %v1254_v0 = vmul.f32 %v1238_v13, %v1220_v17 }
 0x70c   : > { %v1463_v18 = vpop.eup %1462 }
 0x70d   : > { %1258 = vrot.lane.b32.xlu0 %v1254_v0, %s1475_s12  ;;  %v1239_v21 = vmul.f32 %v1463_v18, %v1798_v24 }
 0x70f   : > { %v1255_v12 = vmul.f32 %v1239_v21, %v1221_v57 }
 0x711   : > { %1247 = vperm.xlu0 %1435, %v1239_v21   ;;  %1260 = vrot.lane.b32.xlu1 %v1255_v12, %s1475_s12  ;;  %s1390_s12 = sshll.u32 %s1901_s25, 5 }
 0x712   : > { %s278_s29 = scalar_lea.vmem %s1899_s7, %s1390_s12 }
 0x715   : > { %1242 = vperm.xlu1 %1434, %v1238_v13   ;;  %1437 = vset.pattern.permute.xlu0 %v1483_v45 }
 0x719   : > { %1436 = vset.pattern.permute.xlu1 %v1483_v45 }
 0x77f   : > { %v1259_v34 = vpop.permute.xlu0 %1258 }
 0x780   : > { %v1264_v2 = vsub.f32 %v1793_v23, %v1259_v34 }
 0x782   : > { %1268 = vperm.xlu1 %1436, %v1264_v2  }
 0x783   : > { %v1261_v22 = vpop.permute.xlu1 %1260 }
 0x784   : > { %v1265_v35 = vsub.f32 %v1798_v24, %v1261_v22 }
 0x786   : > { %1273 = vperm.xlu1 %1436, %v1265_v35  }
 0x790   : > { %v1248_v42 = vpop.permute.xlu0 %1247 }
 0x791   : > { %v1252_v45 = vmul.f32 %v1248_v42, %v1844_v28  ;;  %v1253_v10 = vmul.f32 %v1248_v42, %v1846_v26 }
 0x794   : > { %v1243_v30 = vpop.permute.xlu1 %1242 }
 0x795   : > { %v1250_v44 = vmul.f32 %v1243_v30, %v1848_v27  ;;  %v1251_v3 = vmul.f32 %v1243_v30, %v1842_v8 }
 0x801   : > { %v1269_v6 = vpop.permute.xlu1 %1268 }
 0x802   : > { %v1276_v54 = vadd.f32 %v1269_v6, %v1250_v44  ;;  %v1277_v59 = vadd.f32 %v1269_v6, %v1251_v3 }
 0x804   : > { %vm1280_vm12 = vcmp.ge.f32.partialorder %v1276_v54, 0.0  ;;  %vm1281_vm13 = vcmp.ge.f32.partialorder %v1277_v59, 0.0  ;;  %v1284_v23 = vmul.f32 0.01, %v1276_v54  ;;  %v1285_v24 = vmul.f32 0.01, %v1277_v59 }
 0x805   : > { %v1274_v14 = vpop.permute.xlu1 %1273 }
 0x806   : > { %v1288_v31 = vsel %vm1280_vm12, %v1276_v54, %v1284_v23  ;;  %v1289_v33 = vsel %vm1281_vm13, %v1277_v59, %v1285_v24  ;;  %v1278_v8 = vadd.f32 %v1274_v14, %v1252_v45  ;;  %v1279_v16 = vadd.f32 %v1274_v14, %v1253_v10 }
 0x807   : > { %1292 = vst [vmem:[%s278_s29] sm:$0xff] %v1288_v31  ;;  %1293 = vst [vmem:[%s278_s29 + $0x8] sm:$0xff] %v1289_v33 }
 0x808   : > { %vm1282_vm14 = vcmp.ge.f32.partialorder %v1278_v8, 0.0  ;;  %vm1283_vm15 = vcmp.ge.f32.partialorder %v1279_v16, 0.0  ;;  %v1286_v28 = vmul.f32 0.01, %v1278_v8  ;;  %v1287_v4 = vmul.f32 0.01, %v1279_v16 }
 0x80a   : > { %v1290_v26 = vsel %vm1282_vm14, %v1278_v8, %v1286_v28  ;;  %v1291_v27 = vsel %vm1283_vm15, %v1279_v16, %v1287_v4 }
 0x80b   : > { %1294 = vst [vmem:[%s278_s29 + $0x10] sm:$0xff] %v1290_v26  ;;  %1295 = vst [vmem:[%s278_s29 + $0x18] sm:$0xff] %v1291_v27 }
 0x80c PF: > { %s17_s24 = sadd.s32 1, %s1470_s24  }
 0x80d   : > { %p14_p4 = scmp.ge.s32.totalorder %s17_s24, 4  }
 0x80f   :  { %16 = sbr.rel (!%p14_p4) target bundleno = 1 (0x1), region = 78 }

</bundles_post_ra>
